<compile_context>
chip_gen: v5e
topology: v5e:2x2
jax: 0.10.0
libtpu: 0.0.40
codegen_flags: <defaults>
</compile_context>

<pallas_src>
import functools
from typing import NamedTuple

import jax
import jax.numpy as jnp
import numpy as np
from jax.experimental import pallas as pl
from jax.experimental.pallas import tpu as pltpu


def _round_up(n, m):
    return ((n + m - 1) // m) * m


class PackedLLE(NamedTuple):
    w_all: jax.Array   # (F, N) fused, pre-transposed, lane-dense weights (compute dtype)
    b_all: jax.Array   # (1, N) fused bias, float32
    layout: str        # 'dense' (C < 128) or 'blocked'
    S: int             # num_dist_shift
    C: int             # num_classes
    F: int             # in_features
    N: int             # fused lane width (multiple of 128)
    CP: int            # per-head lane block (blocked layout)
    SP: int            # dist-shift lane block (blocked layout)


def pack_lle_params(w, b, wd, bd, *, compute_dtype=None):
    """One-time packing of LastLayerEnsemble parameters (hoisted out of forward).

    w  : (S, C, F) stacked nn.Linear weights (torch [out, in] layout)
    b  : (S, C)    stacked biases
    wd : (S, F)    dist_shift_predictor weight
    bd : (S,)      dist_shift_predictor bias
    """
    S, C, F = w.shape
    assert b.shape == (S, C) and wd.shape == (S, F) and bd.shape == (S,)
    compute_dtype = jnp.dtype(compute_dtype if compute_dtype is not None else w.dtype)

    if C < 128:
        # Dense packing: [head0 | head1 | ... | dist-shift]; only the total
        # width is rounded up to one lane block (avoids the ~128/C blowup).
        layout, CP, SP = "dense", C, S
        used = S * C + S
        N = _round_up(used, 128)
        w_heads = jnp.transpose(w, (2, 0, 1)).reshape(F, S * C)          # (F, S*C)
        w_all = jnp.concatenate([w_heads, wd.T], axis=1)                 # (F, used)
        w_all = jnp.pad(w_all, ((0, 0), (0, N - used)))
        b_all = jnp.concatenate([b.reshape(S * C), bd])
        b_all = jnp.pad(b_all, (0, N - used))
    else:
        # Blocked packing: each head gets its own 128-aligned lane block so the
        # eval-mode in-kernel weighting only touches aligned slices.
        layout = "blocked"
        CP = _round_up(C, 128)
        SP = _round_up(S, 128)
        N = S * CP + SP
        w_t = jnp.pad(jnp.transpose(w, (2, 0, 1)), ((0, 0), (0, 0), (0, CP - C)))
        w_all = jnp.concatenate(
            [w_t.reshape(F, S * CP), jnp.pad(wd.T, ((0, 0), (0, SP - S)))], axis=1)
        b_all = jnp.concatenate(
            [jnp.pad(b, ((0, 0), (0, CP - C))).reshape(S * CP), jnp.pad(bd, (0, SP - S))])

    return PackedLLE(w_all.astype(compute_dtype),
                     b_all.astype(jnp.float32).reshape(1, N),
                     layout, S, C, F, N, CP, SP)


# ----------------------------- kernels --------------------------------------

def _dense_kernel(x_ref, w_ref, b_ref, y_ref):
    # One fused MXU matmul; all heads live in a single (compact) lane block.
    y = jnp.dot(x_ref[...], w_ref[...], preferred_element_type=jnp.float32)
    y_ref[...] = (y + b_ref[...]).astype(y_ref.dtype)


def _blocked_train_kernel(x_ref, w_ref, b_ref, logits_ref, dshift_ref, *, S, CP):
    y = jnp.dot(x_ref[...], w_ref[...], preferred_element_type=jnp.float32)
    y = y + b_ref[...]                                       # (bt, N) f32
    for s in range(S):                                       # aligned 128-lane slices
        logits_ref[:, s, :] = y[:, s * CP:(s + 1) * CP].astype(logits_ref.dtype)
    dshift_ref[...] = y[:, S * CP:].astype(dshift_ref.dtype)


def _blocked_eval_kernel(x_ref, w_ref, b_ref, out_ref, *, S, CP):
    # y is never written back to HBM in eval (dead fused output removed).
    y = jnp.dot(x_ref[...], w_ref[...], preferred_element_type=jnp.float32)
    y = y + b_ref[...]
    d = y[:, S * CP:S * CP + S]                              # dist-shift logits (bt, S)
    d = d - jnp.max(d, axis=1, keepdims=True)
    e = jnp.exp(d)
    p = e * pl.reciprocal(jnp.sum(e, axis=1, keepdims=True), approx=True)   # EUP
    acc = p[:, 0:1] * y[:, 0:CP]
    for s in range(1, S):
        acc = acc + p[:, s:s + 1] * y[:, s * CP:(s + 1) * CP]
    out_ref[...] = acc.astype(out_ref.dtype)


# ----------------------------- wrapper ---------------------------------------

def _choose_batch_tile(B, per_row_bytes, budget_bytes):
    bt = min(256, _round_up(max(B, 8), 8))
    Bp = _round_up(B, 8)
    # v7x megacore only engages with >= 2 steps along the parallel batch axis.
    if Bp // bt < 2 and Bp >= 16:
        bt = _round_up(pl.cdiv(Bp, 2), 8)
    while bt > 8 and bt * per_row_bytes > budget_bytes:
        bt = max(8, _round_up(bt // 2, 8))
    return bt


def lle_forward(x, params: PackedLLE, *, training=False):
    """LastLayerEnsemble forward using pre-packed params (pack_lle_params)."""
    B, F = x.shape
    assert F == params.F, "in_features mismatch"
    S, C, N, CP, SP = params.S, params.C, params.N, params.CP, params.SP
    compute_dtype = params.w_all.dtype
    out_dtype = x.dtype
    csize = jnp.dtype(compute_dtype).itemsize
    osize = jnp.dtype(out_dtype).itemsize

    dense = params.layout == "dense"
    if dense:
        kernel = _dense_kernel
        out_row_elems = N
    elif training:
        kernel = functools.partial(_blocked_train_kernel, S=S, CP=CP)
        out_row_elems = S * CP + SP
    else:
        kernel = functools.partial(_blocked_eval_kernel, S=S, CP=CP)
        out_row_elems = CP

    # --- batch tiling: pad B to a tile multiple; big tiles, >=2 steps if able ---
    resident_bytes = 2 * (F * N * csize + N * 4)
    per_row_bytes = 2 * F * csize + 2 * out_row_elems * osize + 3 * N * 4
    budget = max(4 << 20, (40 << 20) - resident_bytes)
    bt = _choose_batch_tile(B, per_row_bytes, budget)
    B_pad = _round_up(B, bt)
    grid = (B_pad // bt,)

    x_p = x
    if B_pad != B:
        x_p = jnp.pad(x_p, ((0, B_pad - B), (0, 0)))
    if x_p.dtype != compute_dtype:
        x_p = x_p.astype(compute_dtype)

    # --- output shapes / specs ---
    if dense:
        out_shape = (jax.ShapeDtypeStruct((B_pad, N), out_dtype),)
        out_specs = [pl.BlockSpec((bt, N), lambda i: (i, 0))]
    elif training:
        out_shape = (jax.ShapeDtypeStruct((B_pad, S, CP), out_dtype),
                     jax.ShapeDtypeStruct((B_pad, SP), out_dtype))
        out_specs = [pl.BlockSpec((bt, S, CP), lambda i: (i, 0, 0)),
                     pl.BlockSpec((bt, SP), lambda i: (i, 0))]
    else:
        out_shape = (jax.ShapeDtypeStruct((B_pad, CP), out_dtype),)
        out_specs = [pl.BlockSpec((bt, CP), lambda i: (i, 0))]

    # --- VMEM budget (with headroom) and scheduler cost hint ---
    w_bytes = F * N * csize
    out_bytes = B_pad * out_row_elems * osize
    footprint = (2 * (w_bytes + N * 4)                 # resident slabs (x2 headroom)
                 + 2 * bt * F * csize                  # x tile double buffer
                 + 2 * bt * out_row_elems * osize      # out tile double buffer
                 + 4 * bt * N * 4)                     # f32 y value + temporaries
    vmem_limit = min(max(int(1.5 * footprint), 8 << 20), 64 << 20)
    cost = pl.CostEstimate(
        flops=2 * B_pad * F * N,
        transcendentals=0 if (dense or training) else B_pad * S,
        bytes_accessed=B_pad * F * csize + w_bytes + N * 4 + out_bytes)

    def _call(single_buffer_resident):
        if single_buffer_resident and hasattr(pl, "Buffered"):
            # Grid-invariant operands: one buffer is enough (halves weight VMEM).
            w_spec = pl.BlockSpec((F, N), lambda i: (0, 0), pipeline_mode=pl.Buffered(1))
            b_spec = pl.BlockSpec((1, N), lambda i: (0, 0), pipeline_mode=pl.Buffered(1))
        else:
            w_spec = pl.BlockSpec((F, N), lambda i: (0, 0))
            b_spec = pl.BlockSpec((1, N), lambda i: (0, 0))
        return pl.pallas_call(
            kernel,
            out_shape=out_shape,
            grid_spec=pltpu.PrefetchScalarGridSpec(
                num_scalar_prefetch=0,
                grid=grid,
                in_specs=[pl.BlockSpec((bt, F), lambda i: (i, 0)), w_spec, b_spec],
                out_specs=out_specs),
            compiler_params=pltpu.CompilerParams(
                dimension_semantics=("parallel",),
                vmem_limit_bytes=vmem_limit),
            cost_estimate=cost,
        )(x_p, params.w_all, params.b_all)

    try:
        outs = _call(True)
    except Exception:          # pipeline_mode / Buffered(1) unsupported -> default buffering
        outs = _call(False)

    # --- unpack (thin slices only) ---
    if dense:
        y = outs[0][:B]
        logits = y[:, :S * C].reshape(B, S, C)
        dshift = y[:, S * C:S * C + S]
        if training:
            return logits, dshift
        p = jax.nn.softmax(dshift.astype(jnp.float32), axis=1)
        out = jnp.sum(logits.astype(jnp.float32) * p[:, :, None], axis=1)
        return out.astype(out_dtype)
    if training:
        return outs[0][:B, :, :C], outs[1][:B, :S]
    return outs[0][:B, :C]


def last_layer_ensemble(x, w, b, wd, bd, *, training=False, compute_dtype=None):
    """Convenience wrapper (prefer packing once with pack_lle_params)."""
    return lle_forward(x, pack_lle_params(w, b, wd, bd, compute_dtype=compute_dtype),
                       training=training)


# ----------------------------- reference & test ------------------------------

def _reference(x, w, b, wd, bd, training=False):
    xf = x.astype(jnp.float32)
    logits = jnp.einsum('bf,scf->bsc', xf, w.astype(jnp.float32)) + b[None, :, :]
    d = xf @ wd.T.astype(jnp.float32) + bd[None, :]
    if training:
        return logits, d
    p = jax.nn.softmax(d, axis=1)
    return jnp.sum(logits * p[:, :, None], axis=1)


if __name__ == "__main__":
    key = jax.random.PRNGKey(0)

    def make_inputs(k, B, F, C, S):
        kx, kw, kb, kwd, kbd = jax.random.split(k, 5)
        x = jax.random.normal(kx, (B, F), jnp.float32)
        w = jax.random.normal(kw, (S, C, F), jnp.float32) * 0.05
        b = jax.random.normal(kb, (S, C), jnp.float32) * 0.05
        wd = jax.random.normal(kwd, (S, F), jnp.float32) * 0.05
        bd = jax.random.normal(kbd, (S,), jnp.float32) * 0.05
        return x, w, b, wd, bd

    k1, k2 = jax.random.split(key)

    # --- config A: small C -> dense packing path ------------------------------
    x, w, b, wd, bd = make_inputs(k1, B=4, F=32, C=10, S=3)
    params = pack_lle_params(w, b, wd, bd)                       # packed ONCE
    out_eval = jax.block_until_ready(lle_forward(x, params, training=False))
    logits_tr, dsh_tr = jax.block_until_ready(lle_forward(x, params, training=True))

    ref_eval = _reference(x, w, b, wd, bd, training=False)
    ref_logits, ref_d = _reference(x, w, b, wd, bd, training=True)
    np.testing.assert_allclose(np.asarray(out_eval), np.asarray(ref_eval), rtol=1e-4, atol=1e-4)
    np.testing.assert_allclose(np.asarray(logits_tr), np.asarray(ref_logits), rtol=1e-4, atol=1e-4)
    np.testing.assert_allclose(np.asarray(dsh_tr), np.asarray(ref_d), rtol=1e-4, atol=1e-4)

    # --- config B: C >= 128 -> blocked packing, in-kernel eval weighting -------
    xB, wB, bB, wdB, bdB = make_inputs(k2, B=16, F=64, C=128, S=2)
    paramsB = pack_lle_params(wB, bB, wdB, bdB)
    outB_eval = jax.block_until_ready(lle_forward(xB, paramsB, training=False))
    logitsB, dshB = jax.block_until_ready(lle_forward(xB, paramsB, training=True))

    refB_eval = _reference(xB, wB, bB, wdB, bdB, training=False)
    refB_logits, refB_d = _reference(xB, wB, bB, wdB, bdB, training=True)
    # eval uses approx-reciprocal softmax normalization -> slightly looser tol
    np.testing.assert_allclose(np.asarray(outB_eval), np.asarray(refB_eval), rtol=1e-2, atol=1e-2)
    np.testing.assert_allclose(np.asarray(logitsB), np.asarray(refB_logits), rtol=1e-4, atol=1e-4)
    np.testing.assert_allclose(np.asarray(dshB), np.asarray(refB_d), rtol=1e-4, atol=1e-4)

    # --- bf16 compute path (f32 accumulation) ----------------------------------
    paramsB16 = pack_lle_params(wB, bB, wdB, bdB, compute_dtype=jnp.bfloat16)
    outB16 = jax.block_until_ready(lle_forward(xB, paramsB16, training=False))
    np.testing.assert_allclose(np.asarray(outB16), np.asarray(refB_eval), rtol=5e-2, atol=5e-2)

    print("KERNEL_OK")
</pallas_src>

<mosaic_0001>
module attributes {stable_mosaic.version = 11 : i64} {
  func.func @_dense_kernel(%arg0: i32, %arg1: memref<8x32xf32, #tpu.memory_space<vmem>>, %arg2: memref<32x128xf32, #tpu.memory_space<vmem>>, %arg3: memref<1x128xf32, #tpu.memory_space<vmem>>, %arg4: memref<8x128xf32, #tpu.memory_space<vmem>>) attributes {dimension_semantics = [#tpu.dimension_semantics<parallel>], iteration_bounds = array<i64: 1>, scalar_prefetch = 0 : i64, scratch_operands = 0 : i64, tpu.core_type = #tpu.core_type<tc>, window_params = [{transform_indices = @transform_0, window_bounds = array<i64: 8, 32>}, {pipeline_mode = #tpu.pipeline_mode<synchronous>, transform_indices = @transform_1, window_bounds = array<i64: 32, 128>}, {pipeline_mode = #tpu.pipeline_mode<synchronous>, transform_indices = @transform_2, window_bounds = array<i64: 1, 128>}, {transform_indices = @transform_3, window_bounds = array<i64: 8, 128>}]} {
    %c0 = arith.constant 0 : index
    %c0_0 = arith.constant 0 : index
    %0 = vector.load %arg1[%c0, %c0_0] : memref<8x32xf32, #tpu.memory_space<vmem>>, vector<8x32xf32>
    %c0_1 = arith.constant 0 : index
    %c0_2 = arith.constant 0 : index
    %1 = vector.load %arg2[%c0_1, %c0_2] : memref<32x128xf32, #tpu.memory_space<vmem>>, vector<32x128xf32>
    %cst = arith.constant dense<0.000000e+00> : vector<8x128xf32>
    %2 = tpu.matmul %0, %1, %cst {dimension_numbers = #tpu.dot_dimension_numbers<[1], [0], [0], [1], [0, 0, 1, 1], [], []>} : vector<8x32xf32>, vector<32x128xf32>, vector<8x128xf32> -> vector<8x128xf32>
    %c0_3 = arith.constant 0 : index
    %c0_4 = arith.constant 0 : index
    %3 = vector.load %arg3[%c0_3, %c0_4] : memref<1x128xf32, #tpu.memory_space<vmem>>, vector<1x128xf32>
    %4 = vector.broadcast %3 : vector<1x128xf32> to vector<8x128xf32>
    %5 = arith.addf %2, %4 : vector<8x128xf32>
    %c0_5 = arith.constant 0 : index
    %c0_6 = arith.constant 0 : index
    %6 = vector.load %arg4[%c0_5, %c0_6] : memref<8x128xf32, #tpu.memory_space<vmem>>, vector<8x128xf32>
    tpu.vector_store %arg4[%c0_5, %c0_6], %5 {strides = array<i32>} : memref<8x128xf32, #tpu.memory_space<vmem>>, vector<8x128xf32>,
    return
  }
  func.func @transform_0(%arg0: i32) -> (i32, i32) {
    %c0_i32 = arith.constant 0 : i32
    %c0_i32_0 = arith.constant 0 : i32
    return %arg0, %c0_i32 : i32, i32
  }
  func.func @transform_1(%arg0: i32) -> (i32, i32) {
    %c0_i32 = arith.constant 0 : i32
    %c0_i32_0 = arith.constant 0 : i32
    %c0_i32_1 = arith.constant 0 : i32
    return %c0_i32, %c0_i32_0 : i32, i32
  }
  func.func @transform_2(%arg0: i32) -> (i32, i32) {
    %c0_i32 = arith.constant 0 : i32
    %c0_i32_0 = arith.constant 0 : i32
    %c0_i32_1 = arith.constant 0 : i32
    return %c0_i32, %c0_i32_0 : i32, i32
  }
  func.func @transform_3(%arg0: i32) -> (i32, i32) {
    %c0_i32 = arith.constant 0 : i32
    %c0_i32_0 = arith.constant 0 : i32
    return %arg0, %c0_i32 : i32, i32
  }
}

module attributes {stable_mosaic.version = 11 : i64} {
  func.func @_dense_kernel(%arg0: i32, %arg1: memref<8x32xf32, #tpu.memory_space<vmem>>, %arg2: memref<32x128xf32, #tpu.memory_space<vmem>>, %arg3: memref<1x128xf32, #tpu.memory_space<vmem>>, %arg4: memref<8x128xf32, #tpu.memory_space<vmem>>) attributes {dimension_semantics = [#tpu.dimension_semantics<parallel>], iteration_bounds = array<i64: 1>, scalar_prefetch = 0 : i64, scratch_operands = 0 : i64, tpu.core_type = #tpu.core_type<tc>, window_params = [{transform_indices = @transform_0, window_bounds = array<i64: 8, 32>}, {pipeline_mode = #tpu.pipeline_mode<synchronous>, transform_indices = @transform_1, window_bounds = array<i64: 32, 128>}, {pipeline_mode = #tpu.pipeline_mode<synchronous>, transform_indices = @transform_2, window_bounds = array<i64: 1, 128>}, {transform_indices = @transform_3, window_bounds = array<i64: 8, 128>}]} {
    %c0 = arith.constant 0 : index
    %c0_0 = arith.constant 0 : index
    %0 = vector.load %arg1[%c0, %c0_0] : memref<8x32xf32, #tpu.memory_space<vmem>>, vector<8x32xf32>
    %c0_1 = arith.constant 0 : index
    %c0_2 = arith.constant 0 : index
    %1 = vector.load %arg2[%c0_1, %c0_2] : memref<32x128xf32, #tpu.memory_space<vmem>>, vector<32x128xf32>
    %cst = arith.constant dense<0.000000e+00> : vector<8x128xf32>
    %2 = tpu.matmul %0, %1, %cst {dimension_numbers = #tpu.dot_dimension_numbers<[1], [0], [0], [1], [0, 0, 1, 1], [], []>} : vector<8x32xf32>, vector<32x128xf32>, vector<8x128xf32> -> vector<8x128xf32>
    %c0_3 = arith.constant 0 : index
    %c0_4 = arith.constant 0 : index
    %3 = vector.load %arg3[%c0_3, %c0_4] : memref<1x128xf32, #tpu.memory_space<vmem>>, vector<1x128xf32>
    %4 = vector.broadcast %3 : vector<1x128xf32> to vector<8x128xf32>
    %5 = arith.addf %2, %4 : vector<8x128xf32>
    %c0_5 = arith.constant 0 : index
    %c0_6 = arith.constant 0 : index
    %6 = vector.load %arg4[%c0_5, %c0_6] : memref<8x128xf32, #tpu.memory_space<vmem>>, vector<8x128xf32>
    tpu.vector_store %arg4[%c0_5, %c0_6], %5 {strides = array<i32>} : memref<8x128xf32, #tpu.memory_space<vmem>>, vector<8x128xf32>,
    return
  }
  func.func @transform_0(%arg0: i32) -> (i32, i32) {
    %c0_i32 = arith.constant 0 : i32
    %c0_i32_0 = arith.constant 0 : i32
    return %arg0, %c0_i32 : i32, i32
  }
  func.func @transform_1(%arg0: i32) -> (i32, i32) {
    %c0_i32 = arith.constant 0 : i32
    %c0_i32_0 = arith.constant 0 : i32
    %c0_i32_1 = arith.constant 0 : i32
    return %c0_i32, %c0_i32_0 : i32, i32
  }
  func.func @transform_2(%arg0: i32) -> (i32, i32) {
    %c0_i32 = arith.constant 0 : i32
    %c0_i32_0 = arith.constant 0 : i32
    %c0_i32_1 = arith.constant 0 : i32
    return %c0_i32, %c0_i32_0 : i32, i32
  }
  func.func @transform_3(%arg0: i32) -> (i32, i32) {
    %c0_i32 = arith.constant 0 : i32
    %c0_i32_0 = arith.constant 0 : i32
    return %arg0, %c0_i32 : i32, i32
  }
}

</mosaic_0001>

<bundles_post_ra>
// kernel: tpu_custom_call.1
= control target key start
LH: loop header
LB: loop body
LE: loop exit
PB: predicated region body
PF: predicated region fallthrough
CT: control target
= control target key end

     0   :  { %8 = vsyncpa [#allocation3], 0  ;;  %s219_s0 = inlined_call_operand.hbm [shape: f32[8,32], index: 0, kind: input, shape index: {}]   ;;  %s220_s1 = inlined_call_operand.hbm [shape: f32[32,128], index: 1, kind: input, shape index: {}]   ;;  %s221_s2 = inlined_call_operand.vmem [shape: f32[1,128], index: 2, kind: input, shape index: {}]   ;;  %s222_s3 = inlined_call_operand.hbm [shape: f32[8,128], index: 3, kind: output, shape index: {}]  }
   0x1   :  { %9 = vsyncpa [#allocation6], 0 }
   0x2   :  { %10 = vsyncpa [#allocation4], 0  ;;  %s16_s14 = sshll.u32 %s219_s0, 4  ;;  %s182_s15 = smov [#allocation2]   ;;  %s17_s14 = int_to_ptr.hbm [resolvable:$true] %s16_s14 }
   0x3   :  { %s18_s16 = sshll.u32 %s182_s15, 4  ;;  %s26_s19 = sshll.u32 %s220_s1, 4  ;;  %s19_s16 = int_to_ptr.vmem [resolvable:$true] %s18_s16  ;;  %s27_s19 = int_to_ptr.hbm [resolvable:$true] %s26_s19 }
   0x4   :  { %21 = dma.hbm_to_vmem [thread:$0]  %s17_s14, 128, %s19_s16, [#allocation3]  }
   0x5   :  { %s183_s20 = smov [#allocation5]   ;;  %s184_s22 = smov 128  }
   0x6   :  { %s28_s21 = sshll.u32 %s183_s20, 4  ;;  %s185_s23 = smov 8   ;;  %s29_s21 = int_to_ptr.vmem [resolvable:$true] %s28_s21 }
   0x7   :  { %34 = dma.hbm_to_vmem [thread:$0]  %s27_s19, 512, %s29_s21, [#allocation6], %s184_s22, %s184_s22, %s185_s23  }
   0x8   :  { %176 = dma.done.wait [#allocation3], 128  }
   0x9   :  { %177 = vsyncadd [#allocation3], 4294967168 }
   0xa   :  { %178 = dma.done.wait [#allocation6], 512  }
   0xb   :  { %179 = vsyncadd [#allocation6], 4294966784  ;;  %v49_v0 = vld [vmem:[#allocation5 + $0x18] sm:$0xff]  ;;  %v48_v1 = vld [vmem:[#allocation5 + $0x10] sm:$0xff]  ;;  %vm54_vm0 = vcmask 261120   ;;  %s186_s24 = smov [#allocation7]  }
   0xc   :  { %70 = vmatpush.msra.mxu0 %v49_v0  ;;  %v47_v2 = vld [vmem:[#allocation5 + $0x8] sm:$0xff]  ;;  %v46_v3 = vld [vmem:[#allocation5] sm:$0xff]  ;;  %v45_v4 = vld [vmem:[#allocation2] sm:$0xff]  ;;  %s84_s25 = sshll.u32 %s186_s24, 4  ;;  %s86_s28 = sshll.u32 %s222_s3, 4  ;;  %s85_s25 = int_to_ptr.vmem [resolvable:$true] %s84_s25  ;;  %s87_s28 = int_to_ptr.hbm [resolvable:$true] %s86_s28 }
   0xd   :  { %v103_v5 = vld [vmem:[%s221_s2] ss:$0 sm:$0xff] }
   0xe   :  { %71 = vmatpush.msra.mxu0 %v48_v1 }
  0x10   :  { %72 = vmatpush.msra.mxu0 %v47_v2 }
  0x12   :  { %73 = vmatpush.msra.mxu0 %v46_v3 }
  0x13   :  { %97 = vmatmul.msk.f32.vlgmr.msra.gmra.mxu0 %vm54_vm0, %v45_v4 }
  0x90   :  { %v75_v6 = vpop.f32.mrf.mxu0 }
  0x91   :  { %v76_v7 = vadd.f32 %v103_v5, %v75_v6 }
  0x93   :  { %78 = vst [vmem:[#allocation7] sm:$0xff] %v76_v7 }
  0x94   :  { %89 = dma.vmem_to_hbm [thread:$0]  %s85_s25, 128, %s87_s28, [#allocation4]  }
  0x95   :  { %180 = dma.done.wait [#allocation4], 128  }
  0x96   :  { %181 = vsyncadd [#allocation4], 4294967168 }
  0x97   :  { %94 = vsyncpa [#allocation3], 1 }
  0x98   :  { %95 = vsyncpa [#allocation6], 1 }
  0x99   :  { %96 = vsyncpa [#allocation4], 1 }

// kernel: tpu_custom_call.1
= control target key start
LH: loop header
LB: loop body
LE: loop exit
PB: predicated region body
PF: predicated region fallthrough
CT: control target
= control target key end

     0   :  { %8 = vsyncpa [#allocation3], 0  ;;  %s219_s0 = inlined_call_operand.hbm [shape: f32[8,32], index: 0, kind: input, shape index: {}]   ;;  %s220_s1 = inlined_call_operand.hbm [shape: f32[32,128], index: 1, kind: input, shape index: {}]   ;;  %s221_s2 = inlined_call_operand.vmem [shape: f32[1,128], index: 2, kind: input, shape index: {}]   ;;  %s222_s3 = inlined_call_operand.hbm [shape: f32[8,128], index: 3, kind: output, shape index: {}]  }
   0x1   :  { %9 = vsyncpa [#allocation6], 0 }
   0x2   :  { %10 = vsyncpa [#allocation4], 0  ;;  %s16_s14 = sshll.u32 %s219_s0, 4  ;;  %s182_s15 = smov [#allocation2]   ;;  %s17_s14 = int_to_ptr.hbm [resolvable:$true] %s16_s14 }
   0x3   :  { %s18_s16 = sshll.u32 %s182_s15, 4  ;;  %s26_s19 = sshll.u32 %s220_s1, 4  ;;  %s19_s16 = int_to_ptr.vmem [resolvable:$true] %s18_s16  ;;  %s27_s19 = int_to_ptr.hbm [resolvable:$true] %s26_s19 }
   0x4   :  { %21 = dma.hbm_to_vmem [thread:$0]  %s17_s14, 128, %s19_s16, [#allocation3]  }
   0x5   :  { %s183_s20 = smov [#allocation5]   ;;  %s184_s22 = smov 128  }
   0x6   :  { %s28_s21 = sshll.u32 %s183_s20, 4  ;;  %s185_s23 = smov 8   ;;  %s29_s21 = int_to_ptr.vmem [resolvable:$true] %s28_s21 }
   0x7   :  { %34 = dma.hbm_to_vmem [thread:$0]  %s27_s19, 512, %s29_s21, [#allocation6], %s184_s22, %s184_s22, %s185_s23  }
   0x8   :  { %176 = dma.done.wait [#allocation3], 128  }
   0x9   :  { %177 = vsyncadd [#allocation3], 4294967168 }
   0xa   :  { %178 = dma.done.wait [#allocation6], 512  }
   0xb   :  { %179 = vsyncadd [#allocation6], 4294966784  ;;  %v49_v0 = vld [vmem:[#allocation5 + $0x18] sm:$0xff]  ;;  %v48_v1 = vld [vmem:[#allocation5 + $0x10] sm:$0xff]  ;;  %vm54_vm0 = vcmask 261120   ;;  %s186_s24 = smov [#allocation7]  }
   0xc   :  { %70 = vmatpush.msra.mxu0 %v49_v0  ;;  %v47_v2 = vld [vmem:[#allocation5 + $0x8] sm:$0xff]  ;;  %v46_v3 = vld [vmem:[#allocation5] sm:$0xff]  ;;  %v45_v4 = vld [vmem:[#allocation2] sm:$0xff]  ;;  %s84_s25 = sshll.u32 %s186_s24, 4  ;;  %s86_s28 = sshll.u32 %s222_s3, 4  ;;  %s85_s25 = int_to_ptr.vmem [resolvable:$true] %s84_s25  ;;  %s87_s28 = int_to_ptr.hbm [resolvable:$true] %s86_s28 }
   0xd   :  { %v103_v5 = vld [vmem:[%s221_s2] ss:$0 sm:$0xff] }
   0xe   :  { %71 = vmatpush.msra.mxu0 %v48_v1 }
  0x10   :  { %72 = vmatpush.msra.mxu0 %v47_v2 }
  0x12   :  { %73 = vmatpush.msra.mxu0 %v46_v3 }
  0x13   :  { %97 = vmatmul.msk.f32.vlgmr.msra.gmra.mxu0 %vm54_vm0, %v45_v4 }
  0x90   :  { %v75_v6 = vpop.f32.mrf.mxu0 }
  0x91   :  { %v76_v7 = vadd.f32 %v103_v5, %v75_v6 }
  0x93   :  { %78 = vst [vmem:[#allocation7] sm:$0xff] %v76_v7 }
  0x94   :  { %89 = dma.vmem_to_hbm [thread:$0]  %s85_s25, 128, %s87_s28, [#allocation4]  }
  0x95   :  { %180 = dma.done.wait [#allocation4], 128  }
  0x96   :  { %181 = vsyncadd [#allocation4], 4294967168 }
  0x97   :  { %94 = vsyncpa [#allocation3], 1 }
  0x98   :  { %95 = vsyncpa [#allocation6], 1 }
  0x99   :  { %96 = vsyncpa [#allocation4], 1 }

</bundles_post_ra>
